<compile_context>
chip_gen: v5e
topology: v5e:2x2
jax: 0.10.0
libtpu: 0.0.40
codegen_flags: <defaults>
</compile_context>

<pallas_src>
import functools

import jax
import jax.numpy as jnp
from jax.experimental import pallas as pl
from jax.experimental.pallas import tpu as pltpu

LN_EPS = 1e-5


# ----------------------------- Pallas kernel ------------------------------ #
def spt_ln_linear_kernel(x_ref, w_ref, b_ref, o_ref):
    # x_ref: (tm, patch_dim) bf16     -- row tile of patches
    # w_ref: (patch_dim, dim) bf16    -- projection with LN gamma pre-folded
    # b_ref: (1, dim) f32             -- beta @ W + bias
    # o_ref: (tm, dim)
    x = x_ref[...].astype(jnp.float32)          # LN math in f32 (v5e-safe)
    inv_n = 1.0 / x.shape[-1]

    mean = jnp.sum(x, axis=-1, keepdims=True) * inv_n
    xc = x - mean
    var = jnp.sum(xc * xc, axis=-1, keepdims=True) * inv_n
    xn = xc * jax.lax.rsqrt(var + LN_EPS)

    # bf16 operands onto the MXU, f32 accumulation.
    out = jnp.dot(xn.astype(w_ref.dtype), w_ref[...],
                  preferred_element_type=jnp.float32) + b_ref[...]
    o_ref[...] = out.astype(o_ref.dtype)


def _round_up(a, b):
    return (a + b - 1) // b * b


def _min_grid_steps():
    """>=4 steps on 2-TensorCore parts (v7x/v5p/v4) so each core gets >=2
    pipelined iterations under 'parallel' sharding; 1 on single-core parts."""
    try:
        kind = jax.devices()[0].device_kind.lower()
    except Exception:
        return 1
    multi_tc = any(tag in kind for tag in ("v7", "7x", "v5p", "v4"))
    return 4 if multi_tc else 1


def _choose_tm(rows, *, max_tm=4096):
    """Biggest row tile that fits comfortably in VMEM (amortizes per-step
    overhead), multiple of 8 sublanes, while keeping enough grid steps for
    every TensorCore on megacore parts."""
    target = max(8, pl.cdiv(rows, _min_grid_steps()))
    return min(max_tm, _round_up(target, 8))


def spt_ln_linear(patches, gamma, beta, weight, bias, *, tm=None, max_tm=4096,
                  out_dtype=jnp.float32):
    """patches: (rows, patch_dim) -> (rows, dim) via LayerNorm + Linear."""
    rows, patch_dim = patches.shape
    dim = weight.shape[1]

    # Fold the LayerNorm affine into the projection (mathematically identical:
    # (xn*g + b) @ W = xn @ (diag(g) W) + (b @ W)).  Weights bf16, bias f32.
    w_eff = (gamma[:, None] * weight).astype(jnp.bfloat16)
    b_eff = (beta @ weight + bias).reshape(1, dim).astype(jnp.float32)

    if tm is None:
        tm = _choose_tm(rows, max_tm=max_tm)
    tm = _round_up(max(8, tm), 8)

    grid = (pl.cdiv(rows, tm),)   # ragged last block handled by Pallas masking

    cost = pl.CostEstimate(
        flops=2 * rows * patch_dim * dim,
        transcendentals=rows,  # one rsqrt per row
        bytes_accessed=(rows * patch_dim * patches.dtype.itemsize
                        + patch_dim * dim * 2
                        + rows * dim * jnp.dtype(out_dtype).itemsize),
    )

    return pl.pallas_call(
        spt_ln_linear_kernel,
        out_shape=jax.ShapeDtypeStruct((rows, dim), out_dtype),
        grid_spec=pltpu.PrefetchScalarGridSpec(
            num_scalar_prefetch=0,
            grid=grid,
            in_specs=[
                pl.BlockSpec((tm, patch_dim), lambda i: (i, 0)),
                pl.BlockSpec((patch_dim, dim), lambda i: (0, 0)),  # resident
                pl.BlockSpec((1, dim), lambda i: (0, 0)),          # resident
            ],
            out_specs=pl.BlockSpec((tm, dim), lambda i: (i, 0)),
        ),
        compiler_params=pltpu.CompilerParams(
            dimension_semantics=("parallel",)
        ),
        cost_estimate=cost,
    )(patches, w_eff, b_eff)


# ------------------------------- JAX glue --------------------------------- #
@functools.partial(jax.jit, static_argnames=("patch_size",))
def spt_forward(x, params, *, patch_size):
    """x: (B, C, H, W) float32 -> (B, num_patches, dim)."""
    B, C, H, W = x.shape
    P = patch_size
    assert H % P == 0 and W % P == 0
    h, w = H // P, W // P

    # NCHW -> NHWC once (channels minor-most), bf16 to halve all glue traffic.
    xh = jnp.transpose(x, (0, 2, 3, 1)).astype(jnp.bfloat16)
    # One zero-padded image; all 5 views are static slices of it (torch F.pad
    # with a negative counter-pad == shift with zero fill at the border).
    xp = jnp.pad(xh, ((0, 0), (1, 1), (1, 1), (0, 0)))
    views = (
        xp[:, 1:H + 1, 1:W + 1, :],   # original
        xp[:, 1:H + 1, 0:W,     :],   # shift ( 1,-1, 0, 0): x[h, w-1]
        xp[:, 1:H + 1, 2:W + 2, :],   # shift (-1, 1, 0, 0): x[h, w+1]
        xp[:, 0:H,     1:W + 1, :],   # shift ( 0, 0, 1,-1): x[h-1, w]
        xp[:, 2:H + 2, 1:W + 1, :],   # shift ( 0, 0,-1, 1): x[h+1, w]
    )
    # Stack just before C: flattening (5, C) reproduces the torch channel-concat
    # order [orig C, s1 C, s2 C, s3 C, s4 C].
    x5 = jnp.stack(views, axis=3).reshape(B, H, W, 5 * C)

    # 'b (h p1) (w p2) c5 -> b (h w) (p1 p2 c5)'  -- only swaps p1 <-> w.
    # Under jit, XLA fuses slice/stack/transpose into one pass over the slab.
    x5 = x5.reshape(B, h, P, w, P, 5 * C)
    x5 = jnp.transpose(x5, (0, 1, 3, 2, 4, 5))
    patches = x5.reshape(B * h * w, P * P * 5 * C)

    out = spt_ln_linear(
        patches,
        params["ln_gamma"],
        params["ln_beta"],
        params["w"],
        params["b"],
    )
    return out.reshape(B, h * w, -1)


def _torch_style_pad2d_nchw(x, pad):
    """Emulate F.pad(x, (left, right, top, bottom)) on NCHW, negative = crop."""
    l, r, t, b = pad
    x = jnp.pad(
        x, ((0, 0), (0, 0), (max(t, 0), max(b, 0)), (max(l, 0), max(r, 0)))
    )
    H, W = x.shape[2], x.shape[3]
    h0 = -t if t < 0 else 0
    h1 = H + b if b < 0 else H
    w0 = -l if l < 0 else 0
    w1 = W + r if r < 0 else W
    return x[:, :, h0:h1, w0:w1]


_SHIFTS = ((1, -1, 0, 0), (-1, 1, 0, 0), (0, 0, 1, -1), (0, 0, -1, 1))


def spt_reference(x, params, *, patch_size):
    """Pure-JAX f32 reference (NCHW path, mirrors the PyTorch module exactly)."""
    B, C, H, W = x.shape
    P = patch_size
    shifted = [_torch_style_pad2d_nchw(x, s) for s in _SHIFTS]
    x5 = jnp.concatenate([x, *shifted], axis=1)  # (B, 5C, H, W)
    C5 = 5 * C
    h, w = H // P, W // P
    x5 = x5.reshape(B, C5, h, P, w, P)
    x5 = jnp.transpose(x5, (0, 2, 4, 3, 5, 1))  # b h w p1 p2 c
    patches = x5.reshape(B, h * w, P * P * C5).astype(jnp.float32)
    mean = jnp.mean(patches, axis=-1, keepdims=True)
    var = jnp.mean((patches - mean) ** 2, axis=-1, keepdims=True)
    xn = (patches - mean) * jax.lax.rsqrt(var + LN_EPS)
    xn = xn * params["ln_gamma"] + params["ln_beta"]
    return jnp.einsum("bnk,kd->bnd", xn, params["w"]) + params["b"]


# -------------------------------- main ------------------------------------ #
if __name__ == "__main__":
    # Small shapes consistent with the module: channels=3 (module default),
    # dim=128 (smallest lane-dense projection width; real ViT dims are >=128).
    B, C, H, W = 2, 3, 16, 16
    patch_size = 4
    dim = 128
    patch_dim = patch_size * patch_size * 5 * C  # 240

    key = jax.random.PRNGKey(0)
    kx, kw, kb, kg, kbeta = jax.random.split(key, 5)

    x = jax.random.normal(kx, (B, C, H, W), dtype=jnp.float32)

    # Non-trivial LN affine so the folded-weight path is actually exercised.
    params = {
        "ln_gamma": 1.0 + 0.1 * jax.random.normal(kg, (patch_dim,), jnp.float32),
        "ln_beta": 0.1 * jax.random.normal(kbeta, (patch_dim,), jnp.float32),
        "w": jax.random.normal(kw, (patch_dim, dim), jnp.float32)
        * (1.0 / jnp.sqrt(patch_dim)),
        "b": jax.random.normal(kb, (dim,), jnp.float32) * 0.01,
    }

    out = spt_forward(x, params, patch_size=patch_size)
    out = jax.block_until_ready(out)

    ref = spt_reference(x, params, patch_size=patch_size)
    assert out.shape == (B, (H // patch_size) * (W // patch_size), dim)
    # bf16 slab / bf16 matmul operands (f32 accumulation) -> looser tolerance
    # than the pure-f32 path.
    assert jnp.allclose(out.astype(jnp.float32), ref, atol=5e-2, rtol=5e-2), (
        "mismatch vs reference"
    )

    print("KERNEL_OK")
</pallas_src>

<mosaic_0001>
module attributes {stable_mosaic.version = 11 : i64} {
  func.func @spt_ln_linear_kernel(%arg0: i32, %arg1: memref<32x240xbf16, #tpu.memory_space<vmem>>, %arg2: memref<240x128xbf16, #tpu.memory_space<vmem>>, %arg3: memref<1x128xf32, #tpu.memory_space<vmem>>, %arg4: memref<32x128xf32, #tpu.memory_space<vmem>>) attributes {dimension_semantics = [#tpu.dimension_semantics<parallel>], iteration_bounds = array<i64: 1>, scalar_prefetch = 0 : i64, scratch_operands = 0 : i64, tpu.core_type = #tpu.core_type<tc>, window_params = [{transform_indices = @transform_0, window_bounds = array<i64: 32, 240>}, {pipeline_mode = #tpu.pipeline_mode<synchronous>, transform_indices = @transform_1, window_bounds = array<i64: 240, 128>}, {pipeline_mode = #tpu.pipeline_mode<synchronous>, transform_indices = @transform_2, window_bounds = array<i64: 1, 128>}, {transform_indices = @transform_3, window_bounds = array<i64: 32, 128>}]} {
    %c0 = arith.constant 0 : index
    %c0_0 = arith.constant 0 : index
    %0 = vector.load %arg1[%c0, %c0_0] : memref<32x240xbf16, #tpu.memory_space<vmem>>, vector<32x240xbf16>
    %1 = arith.extf %0 : vector<32x240xbf16> to vector<32x240xf32>
    %cst = arith.constant dense<0.000000e+00> : vector<32xf32>
    %2 = vector.multi_reduction <add>, %1, %cst [1] : vector<32x240xf32> to vector<32xf32>
    %3 = vector.shape_cast %2 : vector<32xf32> to vector<32x1xf32>
    %cst_1 = arith.constant 0.00416666688 : f32
    %4 = vector.broadcast %cst_1 : f32 to vector<32x1xf32>
    %5 = arith.mulf %3, %4 : vector<32x1xf32>
    %6 = vector.broadcast %5 : vector<32x1xf32> to vector<32x240xf32>
    %7 = arith.subf %1, %6 : vector<32x240xf32>
    %8 = arith.mulf %7, %7 : vector<32x240xf32>
    %cst_2 = arith.constant dense<0.000000e+00> : vector<32xf32>
    %9 = vector.multi_reduction <add>, %8, %cst_2 [1] : vector<32x240xf32> to vector<32xf32>
    %10 = vector.shape_cast %9 : vector<32xf32> to vector<32x1xf32>
    %cst_3 = arith.constant 0.00416666688 : f32
    %11 = vector.broadcast %cst_3 : f32 to vector<32x1xf32>
    %12 = arith.mulf %10, %11 : vector<32x1xf32>
    %cst_4 = arith.constant 9.99999974E-6 : f32
    %13 = vector.broadcast %cst_4 : f32 to vector<32x1xf32>
    %14 = arith.addf %12, %13 : vector<32x1xf32>
    %15 = math.rsqrt %14 : vector<32x1xf32>
    %16 = vector.broadcast %15 : vector<32x1xf32> to vector<32x240xf32>
    %17 = arith.mulf %7, %16 : vector<32x240xf32>
    %18 = arith.truncf %17 : vector<32x240xf32> to vector<32x240xbf16>
    %c0_5 = arith.constant 0 : index
    %c0_6 = arith.constant 0 : index
    %19 = vector.load %arg2[%c0_5, %c0_6] : memref<240x128xbf16, #tpu.memory_space<vmem>>, vector<240x128xbf16>
    %cst_7 = arith.constant dense<0.000000e+00> : vector<32x128xf32>
    %20 = tpu.matmul %18, %19, %cst_7 {dimension_numbers = #tpu.dot_dimension_numbers<[1], [0], [0], [1], [0, 0, 1, 1], [], []>} : vector<32x240xbf16>, vector<240x128xbf16>, vector<32x128xf32> -> vector<32x128xf32>
    %c0_8 = arith.constant 0 : index
    %c0_9 = arith.constant 0 : index
    %21 = vector.load %arg3[%c0_8, %c0_9] : memref<1x128xf32, #tpu.memory_space<vmem>>, vector<1x128xf32>
    %22 = vector.broadcast %21 : vector<1x128xf32> to vector<32x128xf32>
    %23 = arith.addf %20, %22 : vector<32x128xf32>
    %c0_10 = arith.constant 0 : index
    %c0_11 = arith.constant 0 : index
    %24 = vector.load %arg4[%c0_10, %c0_11] : memref<32x128xf32, #tpu.memory_space<vmem>>, vector<32x128xf32>
    tpu.vector_store %arg4[%c0_10, %c0_11], %23 {strides = array<i32>} : memref<32x128xf32, #tpu.memory_space<vmem>>, vector<32x128xf32>,
    return
  }
  func.func @transform_0(%arg0: i32) -> (i32, i32) {
    %c0_i32 = arith.constant 0 : i32
    %c0_i32_0 = arith.constant 0 : i32
    return %arg0, %c0_i32 : i32, i32
  }
  func.func @transform_1(%arg0: i32) -> (i32, i32) {
    %c0_i32 = arith.constant 0 : i32
    %c0_i32_0 = arith.constant 0 : i32
    %c0_i32_1 = arith.constant 0 : i32
    return %c0_i32, %c0_i32_0 : i32, i32
  }
  func.func @transform_2(%arg0: i32) -> (i32, i32) {
    %c0_i32 = arith.constant 0 : i32
    %c0_i32_0 = arith.constant 0 : i32
    %c0_i32_1 = arith.constant 0 : i32
    return %c0_i32, %c0_i32_0 : i32, i32
  }
  func.func @transform_3(%arg0: i32) -> (i32, i32) {
    %c0_i32 = arith.constant 0 : i32
    %c0_i32_0 = arith.constant 0 : i32
    return %arg0, %c0_i32 : i32, i32
  }
}

</mosaic_0001>

<bundles_post_ra>
// kernel: spt_forward.1
= control target key start
LH: loop header
LB: loop body
LE: loop exit
PB: predicated region body
PF: predicated region fallthrough
CT: control target
= control target key end

     0   :  { %vm28_vm0 = vcmask 916480   ;;  %s597_s0 = inlined_call_operand.vmem [shape: bf16[32,240], index: 0, kind: input, shape index: {}]   ;;  %s598_s1 = inlined_call_operand.vmem [shape: bf16[240,128], index: 1, kind: input, shape index: {}]   ;;  %s599_s2 = inlined_call_operand.vmem [shape: f32[1,128], index: 2, kind: input, shape index: {}]   ;;  %s600_s3 = inlined_call_operand.hbm [shape: f32[32,128], index: 3, kind: output, shape index: {}]  }
   0x1   :  { %v18_v0 = vld [vmem:[%s597_s0 + $0x10] sm:$0xff]  ;;  %v16_v1 = vld [vmem:[%s597_s0] sm:$0xff]  ;;  %v19_v2 = vld [vmem:[%s597_s0 + $0x18] sm:$0xff] }
   0x2   :  { %v24_v3 = vunpack.c.l.bf16 %v18_v0  ;;  %v25_v4 = vunpack.c.h.bf16 %v18_v0  ;;  %v20_v5 = vunpack.c.l.bf16 %v16_v1  ;;  %v21_v6 = vunpack.c.h.bf16 %v16_v1  ;;  %v17_v7 = vld [vmem:[%s597_s0 + $0x8] sm:$0xff] }
   0x3   :  { %8 = vsyncpa [#allocation3], 0  ;;  %v27_v10 = vunpack.c.h.bf16 %v19_v2  ;;  %v23_v11 = vunpack.c.h.bf16 %v17_v7  ;;  %v26_v14 = vunpack.c.l.bf16 %v19_v2  ;;  %v22_v15 = vunpack.c.l.bf16 %v17_v7  ;;  %v400_v52 = vld [vmem:[%s598_s1 + $0x38] sm:$0xff]  ;;  %v399_v53 = vld [vmem:[%s598_s1 + $0x30] sm:$0xff]  ;;  %s461_s22 = smov [#allocation2]   ;;  %s462_s26 = smov 128  }
   0x4   :  { %v37_v8 = vsel %vm28_vm0, %v25_v4, 0.0  ;;  %v29_v9 = vsel %vm28_vm0, %v21_v6, 0.0  ;;  %271 = vmatpush.bf16.msra.mxu0 %v400_v52  ;;  %408 = vmatpush.bf16.msra.mxu2 %v400_v52  ;;  %v407_v54 = vld [vmem:[%s598_s1 + $0x70] sm:$0xff]  ;;  %v398_v55 = vld [vmem:[%s598_s1 + $0x28] sm:$0xff]  ;;  %v397_v57 = vld [vmem:[%s598_s1 + $0x20] sm:$0xff]  ;;  %s317_s23 = sshll.u32 %s461_s22, 4  ;;  %s318_s23 = int_to_ptr.vmem [resolvable:$true] %s317_s23 }
   0x5   :  { %v38_v12 = vadd.f32 %v37_v8, %v24_v3  ;;  %v30_v13 = vadd.f32 %v29_v9, %v20_v5  ;;  %v41_v16 = vsel %vm28_vm0, %v27_v10, 0.0  ;;  %v33_v17 = vsel %vm28_vm0, %v23_v11, 0.0  ;;  %291 = vmatpush.bf16.msra.mxu1 %v407_v54  ;;  %416 = vmatpush.bf16.msra.mxu3 %v407_v54  ;;  %v406_v56 = vld [vmem:[%s598_s1 + $0x68] sm:$0xff]  ;;  %v405_v58 = vld [vmem:[%s598_s1 + $0x60] sm:$0xff]  ;;  %v396_v59 = vld [vmem:[%s598_s1 + $0x18] sm:$0xff]  ;;  %s463_s27 = smov 8  }
   0x6   :  { %v42_v18 = vadd.f32 %v41_v16, %v26_v14  ;;  %v34_v19 = vadd.f32 %v33_v17, %v22_v15  ;;  %v404_v60 = vld [vmem:[%s598_s1 + $0x58] sm:$0xff]  ;;  %v395_v61 = vld [vmem:[%s598_s1 + $0x10] sm:$0xff]  ;;  %v394_v63 = vld [vmem:[%s598_s1 + $0x8] sm:$0xff] }
   0x7   :  { %39 = vadd.xlane.f32.xlu0 %v38_v12  ;;  %31 = vadd.xlane.f32.xlu1 %v30_v13  ;;  %v403_v62 = vld [vmem:[%s598_s1 + $0x50] sm:$0xff]  ;;  %v402_v0 = vld [vmem:[%s598_s1 + $0x48] sm:$0xff]  ;;  %v393_v1 = vld [vmem:[%s598_s1] sm:$0xff] }
   0x8   :  { %272 = vmatpush.bf16.msra.mxu0 %v399_v53  ;;  %409 = vmatpush.bf16.msra.mxu2 %v399_v53  ;;  %v401_v2 = vld [vmem:[%s598_s1 + $0x40] sm:$0xff] }
   0x9   :  { %292 = vmatpush.bf16.msra.mxu1 %v406_v56  ;;  %417 = vmatpush.bf16.msra.mxu3 %v406_v56 }
   0xc   :  { %273 = vmatpush.bf16.msra.mxu0 %v398_v55  ;;  %410 = vmatpush.bf16.msra.mxu2 %v398_v55 }
   0xd   :  { %293 = vmatpush.bf16.msra.mxu1 %v405_v58  ;;  %418 = vmatpush.bf16.msra.mxu3 %v405_v58 }
   0xf   :  { %43 = vadd.xlane.f32.xlu0 %v42_v18  ;;  %35 = vadd.xlane.f32.xlu1 %v34_v19 }
  0x10   :  { %274 = vmatpush.bf16.msra.mxu0 %v397_v57  ;;  %411 = vmatpush.bf16.msra.mxu2 %v397_v57 }
  0x11   :  { %294 = vmatpush.bf16.msra.mxu1 %v404_v60  ;;  %419 = vmatpush.bf16.msra.mxu3 %v404_v60 }
  0x14   :  { %275 = vmatpush.bf16.msra.mxu0 %v396_v59  ;;  %412 = vmatpush.bf16.msra.mxu2 %v396_v59 }
  0x15   :  { %295 = vmatpush.bf16.msra.mxu1 %v403_v62  ;;  %420 = vmatpush.bf16.msra.mxu3 %v403_v62 }
  0x18   :  { %276 = vmatpush.bf16.msra.mxu0 %v395_v61  ;;  %413 = vmatpush.bf16.msra.mxu2 %v395_v61 }
  0x19   :  { %296 = vmatpush.bf16.msra.mxu1 %v402_v0  ;;  %421 = vmatpush.bf16.msra.mxu3 %v402_v0 }
  0x1c   :  { %277 = vmatpush.bf16.msra.mxu0 %v394_v63  ;;  %414 = vmatpush.bf16.msra.mxu2 %v394_v63 }
  0x1d   :  { %297 = vmatpush.bf16.msra.mxu1 %v401_v2  ;;  %422 = vmatpush.bf16.msra.mxu3 %v401_v2 }
  0x20   :  { %278 = vmatpush.bf16.msra.mxu0 %v393_v1  ;;  %415 = vmatpush.bf16.msra.mxu2 %v393_v1 }
  0x7a   :  { %v40_v20 = vpop.xlane.xlu0 %39  ;;  %v32_v21 = vpop.xlane.xlu1 %31 }
  0x7b   :  { %v47_v22 = vmul.f32 0.004166667, %v40_v20  ;;  %v45_v23 = vmul.f32 0.004166667, %v32_v21 }
  0x7d   :  { %v500_v24 = vsub.f32 %v24_v3, %v47_v22  ;;  %v502_v25 = vsub.f32 %v25_v4, %v47_v22  ;;  %v504_v26 = vsub.f32 %v20_v5, %v45_v23  ;;  %v506_v27 = vsub.f32 %v21_v6, %v45_v23 }
  0x7f   :  { %v61_v28 = vmul.f32 %v500_v24, %v500_v24  ;;  %v62_v29 = vmul.f32 %v502_v25, %v502_v25  ;;  %v57_v30 = vmul.f32 %v504_v26, %v504_v26  ;;  %v58_v31 = vmul.f32 %v506_v27, %v506_v27 }
  0x81   :  { %v73_v32 = vsel %vm28_vm0, %v62_v29, 0.0  ;;  %v65_v33 = vsel %vm28_vm0, %v58_v31, 0.0 }
  0x82   :  { %v44_v34 = vpop.xlane.xlu0 %43  ;;  %v36_v35 = vpop.xlane.xlu1 %35  ;;  %v74_v36 = vadd.f32 %v73_v32, %v61_v28  ;;  %v66_v37 = vadd.f32 %v65_v33, %v57_v30 }
  0x83   :  { %v48_v38 = vmul.f32 0.004166667, %v44_v34  ;;  %v46_v39 = vmul.f32 0.004166667, %v36_v35 }
  0x84   :  { %75 = vadd.xlane.f32.xlu2 %v74_v36  ;;  %67 = vadd.xlane.f32.xlu0 %v66_v37 }
  0x85   :  { %v518_v40 = vsub.f32 %v26_v14, %v48_v38  ;;  %v520_v41 = vsub.f32 %v27_v10, %v48_v38  ;;  %v522_v42 = vsub.f32 %v22_v15, %v46_v39  ;;  %v524_v43 = vsub.f32 %v23_v11, %v46_v39 }
  0x87   :  { %v63_v44 = vmul.f32 %v518_v40, %v518_v40  ;;  %v64_v45 = vmul.f32 %v520_v41, %v520_v41  ;;  %v59_v46 = vmul.f32 %v522_v42, %v522_v42  ;;  %v60_v47 = vmul.f32 %v524_v43, %v524_v43 }
  0x89   :  { %v77_v48 = vsel %vm28_vm0, %v64_v45, 0.0  ;;  %v69_v49 = vsel %vm28_vm0, %v60_v47, 0.0 }
  0x8a   :  { %v78_v50 = vadd.f32 %v77_v48, %v63_v44  ;;  %v70_v51 = vadd.f32 %v69_v49, %v59_v46 }
  0x8c   :  { %79 = vadd.xlane.f32.xlu2 %v78_v50  ;;  %71 = vadd.xlane.f32.xlu1 %v70_v51 }
  0xf7   :  { %v76_v3 = vpop.xlane.xlu2 %75  ;;  %v68_v4 = vpop.xlane.xlu0 %67 }
  0xf8   :  { %v83_v5 = vmul.f32 0.004166667, %v76_v3  ;;  %v81_v6 = vmul.f32 0.004166667, %v68_v4 }
  0xfa   :  { %v87_v7 = vadd.f32 1e-05, %v83_v5  ;;  %v85_v8 = vadd.f32 1e-05, %v81_v6 }
  0xfc   :  { %427 = vrsqrt.f32 %v87_v7  ;;  %vm115_vm2 = vweird.f32 %v87_v7  ;;  %vm95_vm6 = vweird.f32 %v85_v8 }
  0xfd   :  { %429 = vrsqrt.f32 %v85_v8 }
  0xff   :  { %v80_v9 = vpop.xlane.xlu2 %79  ;;  %v72_v10 = vpop.xlane.xlu1 %71 }
 0x100   :  { %v84_v11 = vmul.f32 0.004166667, %v80_v9  ;;  %v82_v12 = vmul.f32 0.004166667, %v72_v10 }
 0x102   :  { %v428_v13 = vpop.eup %427  ;;  %v88_v14 = vadd.f32 1e-05, %v84_v11  ;;  %v86_v15 = vadd.f32 1e-05, %v82_v12 }
 0x103   :  { %v430_v16 = vpop.eup %429  ;;  %v110_v17 = vmul.f32 %v428_v13, %v87_v7  ;;  %vm116_vm1 = vweird.f32 %v428_v13 }
 0x104   :  { %v90_v18 = vmul.f32 %v430_v16, %v85_v8  ;;  %431 = vrsqrt.f32 %v88_v14  ;;  %vm96_vm3 = vweird.f32 %v430_v16  ;;  %vm117_vm4 = vmor %vm115_vm2, %vm116_vm1  ;;  %vm125_vm9 = vweird.f32 %v88_v14 }
 0x105   :  { %v111_v19 = vmul.f32 %v428_v13, %v110_v17  ;;  %433 = vrsqrt.f32 %v86_v15  ;;  %vm97_vm8 = vmor %vm95_vm6, %vm96_vm3  ;;  %vm105_vm11 = vweird.f32 %v86_v15 }
 0x106   :  { %v91_v20 = vmul.f32 %v430_v16, %v90_v18 }
 0x107   :  { %v112_v21 = vmul.f32 0.5, %v111_v19 }
 0x108   :  { %v92_v22 = vmul.f32 0.5, %v91_v20 }
 0x109   :  { %v113_v28 = vsub.f32 1.5, %v112_v21 }
 0x10a   :  { %v432_v23 = vpop.eup %431  ;;  %v93_v31 = vsub.f32 1.5, %v92_v22 }
 0x10b   :  { %v434_v29 = vpop.eup %433  ;;  %v120_v30 = vmul.f32 %v432_v23, %v88_v14  ;;  %v114_v35 = vmul.f32 %v428_v13, %v113_v28  ;;  %vm126_vm5 = vweird.f32 %v432_v23 }
 0x10c   :  { %v100_v32 = vmul.f32 %v434_v29, %v86_v15  ;;  %v94_v38 = vmul.f32 %v430_v16, %v93_v31  ;;  %vm106_vm7 = vweird.f32 %v434_v29  ;;  %vm127_vm10 = vmor %vm125_vm9, %vm126_vm5 }
 0x10d   :  { %v121_v33 = vmul.f32 %v432_v23, %v120_v30  ;;  %v118_v45 = vsel %vm117_vm4, %v428_v13, %v114_v35  ;;  %vm107_vm12 = vmor %vm105_vm11, %vm106_vm7 }
 0x10e   :  { %v101_v34 = vmul.f32 %v434_v29, %v100_v32  ;;  %v98_v47 = vsel %vm97_vm8, %v430_v16, %v94_v38  ;;  %v133_v50 = vmul.f32 %v118_v45, %v500_v24  ;;  %v134_v52 = vmul.f32 %v118_v45, %v502_v25  ;;  %v426_v24 = vld [vmem:[%s599_s2] ss:$0 sm:$0xff]  ;;  %s319_s2 = sshll.u32 %s600_s3, 4  ;;  %s320_s2 = int_to_ptr.hbm [resolvable:$true] %s319_s2 }
 0x10f   :  { %v122_v36 = vmul.f32 0.5, %v121_v33  ;;  %v129_v55 = vmul.f32 %v98_v47, %v504_v26  ;;  %v130_v56 = vmul.f32 %v98_v47, %v506_v27 }
 0x110   :  { %v102_v37 = vmul.f32 0.5, %v101_v34 }
 0x111   :  { %v123_v39 = vsub.f32 1.5, %v122_v36 }
 0x112   :  { %v103_v44 = vsub.f32 1.5, %v102_v37 }
 0x113   :  { %v124_v46 = vmul.f32 %v432_v23, %v123_v39 }
 0x114   :  { %v104_v48 = vmul.f32 %v434_v29, %v103_v44 }
 0x115   :  { %v128_v49 = vsel %vm127_vm10, %v432_v23, %v124_v46 }
 0x116   :  { %v108_v51 = vsel %vm107_vm12, %v434_v29, %v104_v48  ;;  %v135_v53 = vmul.f32 %v128_v49, %v518_v40  ;;  %v136_v54 = vmul.f32 %v128_v49, %v520_v41 }
 0x117   :  { %v131_v57 = vmul.f32 %v108_v51, %v522_v42  ;;  %v132_v58 = vmul.f32 %v108_v51, %v524_v43 }
 0x118   :  { %v139_v59 = vpack.c.bf16 %v135_v53, %v133_v50  ;;  %v140_v60 = vpack.c.bf16 %v136_v54, %v134_v52 }
 0x119   :  { %v137_v61 = vpack.c.bf16 %v131_v57, %v129_v55  ;;  %v138_v62 = vpack.c.bf16 %v132_v58, %v130_v56 }
 0x11a   :  { %284 = vmatmul.bf16.vlgmr.msra.gmra.mxu2 %v139_v59  ;;  %392 = vmatmul.msk.bf16.vlgmr.msra.gmra.mxu3 %vm28_vm0, %v140_v60 }
 0x11b   :  { %279 = vmatmul.bf16.vlgmr.msra.gmra.mxu0 %v137_v61  ;;  %391 = vmatmul.msk.bf16.vlgmr.msra.gmra.mxu1 %vm28_vm0, %v138_v62 }
 0x198   :  { %v280_v25 = vpop.f32.mrf.mxu0  ;;  %v299_v26 = vpop.f32.mrf.mxu1 }
 0x199   :  { %v281_v27 = vadd.f32 %v426_v24, %v280_v25 }
 0x19b   :  { %v300_v40 = vadd.f32 %v299_v26, %v281_v27 }
 0x19d   :  { %309 = vst [vmem:[#allocation2] sm:$0xff] %v300_v40  ;;  %v285_v41 = vpop.f32.mrf.mxu2  ;;  %v304_v42 = vpop.f32.mrf.mxu3 }
 0x19e   :  { %v286_v43 = vadd.f32 %v426_v24, %v285_v41 }
 0x1a0   :  { %v305_v63 = vadd.f32 %v304_v42, %v286_v43  ;;  %v282_v0 = vpop.f32.mrf.mxu0  ;;  %v301_v2 = vpop.f32.mrf.mxu1 }
 0x1a1   :  { %v283_v1 = vadd.f32 %v426_v24, %v282_v0 }
 0x1a2   :  { %311 = vst [vmem:[#allocation2 + $0x10] sm:$0xff] %v305_v63 }
 0x1a3   :  { %v302_v3 = vadd.f32 %v301_v2, %v283_v1 }
 0x1a5   :  { %310 = vst [vmem:[#allocation2 + $0x8] sm:$0xff] %v302_v3  ;;  %v287_v4 = vpop.f32.mrf.mxu2  ;;  %v306_v6 = vpop.f32.mrf.mxu3 }
 0x1a6   :  { %v288_v5 = vadd.f32 %v426_v24, %v287_v4 }
 0x1a8   :  { %v307_v7 = vadd.f32 %v306_v6, %v288_v5 }
 0x1aa   :  { %312 = vst [vmem:[#allocation2 + $0x18] sm:$0xff] %v307_v7 }
 0x1ab   :  { %325 = dma.vmem_to_hbm [thread:$0]  %s318_s23, 512, %s320_s2, [#allocation3], %s462_s26, %s462_s26, %s463_s27  }
 0x1ac   :  { %459 = dma.done.wait [#allocation3], 512  }
 0x1ad   :  { %460 = vsyncadd [#allocation3], 4294966784 }
 0x1ae   :  { %330 = vsyncpa [#allocation3], 1 }

</bundles_post_ra>
